<compile_context>
chip_gen: v7x
topology: tpu7x:2x2x1
jax: 0.10.0
libtpu: 0.0.40
codegen_flags: <defaults>
</compile_context>

<pallas_src>
import functools

import jax
import jax.numpy as jnp
from jax.experimental import pallas as pl
from jax.experimental.pallas import tpu as pltpu


# ---------------------------------------------------------------------------
# Hardware / feature probes
# ---------------------------------------------------------------------------
def _vmem_capacity_bytes():
    try:
        return int(pltpu.get_tpu_info().vmem_capacity_bytes)
    except Exception:
        return 64 * 1024 * 1024            # conservative: v7x per-TensorCore VMEM


def _probe_single_buffering():
    # Grid-invariant operands don't need double buffering; Buffered(1) halves
    # their VMEM footprint.  Probe so we degrade gracefully on older jax.
    try:
        pl.BlockSpec((8, 128), lambda i: (0, 0), pipeline_mode=pl.Buffered(1))
        return True
    except Exception:
        return False


_SINGLE_BUFFER_OK = _probe_single_buffering()


def _invariant_spec(block_shape, index_map):
    if _SINGLE_BUFFER_OK:
        return pl.BlockSpec(block_shape, index_map, pipeline_mode=pl.Buffered(1))
    return pl.BlockSpec(block_shape, index_map)


# ---------------------------------------------------------------------------
# In-kernel LayerNormalization (torch semantics: unbiased std, std + eps)
# ---------------------------------------------------------------------------
def _layer_norm(x, alpha, beta, *, d_model, d_pad, epsilon, approx_recip):
    mean = jnp.sum(x, axis=-1, keepdims=True) * (1.0 / d_model)
    diff = x - mean
    if d_pad != d_model:
        # Padded lanes of x are zero, but diff = -mean there; mask them out of
        # the variance.  alpha/beta are zero-padded, so padded output lanes = 0.
        lane = jax.lax.broadcasted_iota(jnp.int32, (1, d_pad), 1)
        diff_m = jnp.where(lane < d_model, diff, 0.0)
    else:
        diff_m = diff
    var = jnp.sum(diff_m * diff_m, axis=-1, keepdims=True) * (1.0 / (d_model - 1))
    denom = jnp.sqrt(var) + epsilon
    inv = pl.reciprocal(denom, approx=True) if approx_recip else 1.0 / denom
    return alpha * diff * inv + beta


# ---------------------------------------------------------------------------
# Kernel A: all layer weights resident in VMEM (1-D row-tile grid)
# ---------------------------------------------------------------------------
def _resident_encoder_kernel(x_ref, w_ref, b_ref, alpha_ref, beta_ref,
                             out_ref, loss_ref, *, num_layers, d_model, d_pad,
                             epsilon, approx_recip):
    x = x_ref[...].astype(jnp.float32)                 # (tm, d_pad), f32 math
    mm_dtype = w_ref.dtype                             # bf16 (or f32) MXU inputs
    sq = jnp.zeros_like(x)                             # elementwise loss accumulator

    for l in range(num_layers):                        # static unroll; W/b stay in VMEM
        y = x + jnp.dot(x.astype(mm_dtype), w_ref[l],
                        preferred_element_type=jnp.float32) + b_ref[l]
        sq = sq + y * y                                # VPU only; no per-layer XLU reduce
        x = y

    out_ref[...] = _layer_norm(
        x, alpha_ref[...], beta_ref[...], d_model=d_model, d_pad=d_pad,
        epsilon=epsilon, approx_recip=approx_recip).astype(out_ref.dtype)
    loss_ref[...] = jnp.broadcast_to(jnp.sum(sq), loss_ref.shape)  # 1 reduce / tile


# ---------------------------------------------------------------------------
# Kernel B: weight-streaming fallback (grid = (tiles, layers), carry in VMEM)
# ---------------------------------------------------------------------------
def _streaming_encoder_kernel(x_ref, w_ref, b_ref, alpha_ref, beta_ref,
                              out_ref, loss_ref, carry_ref, sq_ref, *,
                              num_layers, d_model, d_pad, epsilon, approx_recip):
    l = pl.program_id(1)

    @pl.when(l == 0)
    def _():
        carry_ref[...] = x_ref[...].astype(jnp.float32)
        sq_ref[...] = jnp.zeros_like(sq_ref)

    xl = carry_ref[...]
    y = xl + jnp.dot(xl.astype(w_ref.dtype), w_ref[0],
                     preferred_element_type=jnp.float32) + b_ref[0]
    sq_ref[...] = sq_ref[...] + y * y
    carry_ref[...] = y

    @pl.when(l == num_layers - 1)
    def _():
        out_ref[...] = _layer_norm(
            y, alpha_ref[...], beta_ref[...], d_model=d_model, d_pad=d_pad,
            epsilon=epsilon, approx_recip=approx_recip).astype(out_ref.dtype)
        loss_ref[...] = jnp.broadcast_to(jnp.sum(sq_ref[...]), loss_ref.shape)


# ---------------------------------------------------------------------------
# Row-tile selection with explicit VMEM accounting
# ---------------------------------------------------------------------------
def _choose_row_tile(rows, *, bytes_per_row, resident_bytes, budget_bytes, max_tm):
    def fits(tm):
        return resident_bytes + tm * bytes_per_row <= budget_bytes

    cap = max(8, min(rows, max_tm))
    divisors8 = [t for t in range(8, cap + 1, 8) if rows % t == 0]

    # Prefer >= 2 tiles (v7x megacore), largest tile, 128-row aligned if possible.
    multi = [t for t in divisors8 if rows // t >= 2 and fits(t)]
    if multi:
        m128 = [t for t in multi if t % 128 == 0]
        return max(m128) if m128 else max(multi)

    single = [t for t in divisors8 if fits(t)]
    if single:
        return max(single)

    if fits(rows):
        # TODO(synk): rows has no multiple-of-8 divisor within budget; a single
        # full-rows block is used (legal: block dims == full array dims).
        return rows

    raise ValueError(
        "original_encoder_forward: no row tile fits the VMEM budget "
        f"(rows={rows}, bytes/row={bytes_per_row}, resident={resident_bytes}, "
        f"budget={budget_bytes}); pad rows or reduce d_model/layers.")


# ---------------------------------------------------------------------------
# Wrapper mirroring OriginalEncoder.forward
# ---------------------------------------------------------------------------
def original_encoder_forward(x, layer_params, norm_alpha, norm_bias,
                             epsilon=1e-6, *, max_rows_per_tile=1024,
                             use_bf16_matmul=True, approx_recip=True,
                             force_stream=None):
    """Fused Pallas equivalent of OriginalEncoder.forward -> (normed_x, loss).

    # TODO(synk): the real `layers` nn.ModuleList is injected externally and its
    # internals are unspecified; each layer is stood in by a residual linear
    # (y = x + x @ W + b) whose auxiliary loss is mean(y**2); per-layer losses
    # are summed exactly like the torch loop does.
    """
    B, S, D = x.shape
    rows = B * S
    L = len(layer_params)

    if L == 0:
        # torch: loop body never runs -> loss stays None; only LayerNorm applies.
        zero = (jnp.zeros((D, D), jnp.float32), jnp.zeros((D,), jnp.float32))
        out, _ = original_encoder_forward(
            x, [zero], norm_alpha, norm_bias, epsilon,
            max_rows_per_tile=max_rows_per_tile,
            use_bf16_matmul=use_bf16_matmul, approx_recip=approx_recip,
            force_stream=force_stream)
        return out, None

    # ----- layout / dtype plumbing (hoisted, done once) ----------------------
    d_pad = -(-D // 128) * 128             # lane-align d_model (MXU + dense stores)
    in_dtype = x.dtype                      # activations stream HBM<->VMEM natively
    out_dtype = x.dtype
    w_dtype = jnp.bfloat16 if use_bf16_matmul else jnp.float32

    x2d = x.reshape(rows, D)
    w_stack = jnp.stack([w for (w, _) in layer_params]).astype(w_dtype)       # (L,D,D)
    b_stack = jnp.stack([b for (_, b) in layer_params]).astype(jnp.float32)   # (L,D)
    alpha = norm_alpha.astype(jnp.float32).reshape(1, D)
    beta = norm_bias.astype(jnp.float32).reshape(1, D)
    if d_pad != D:
        pad = d_pad - D
        x2d = jnp.pad(x2d, ((0, 0), (0, pad)))
        w_stack = jnp.pad(w_stack, ((0, 0), (0, pad), (0, pad)))
        b_stack = jnp.pad(b_stack, ((0, 0), (0, pad)))
        alpha = jnp.pad(alpha, ((0, 0), (0, pad)))   # zero in pad lanes ->
        beta = jnp.pad(beta, ((0, 0), (0, pad)))     #   padded output lanes are 0
    b_stack = b_stack.reshape(L, 1, d_pad)

    # ----- chip-aware VMEM budgeting -----------------------------------------
    cap = _vmem_capacity_bytes()            # 128 MiB v5e/v6e, 64 MiB/core v7x
    budget = int(cap * 0.66)
    vmem_limit = int(cap * 0.80)

    in_b = jnp.dtype(in_dtype).itemsize
    out_b = jnp.dtype(out_dtype).itemsize
    w_b = jnp.dtype(w_dtype).itemsize
    wmul = 1 if _SINGLE_BUFFER_OK else 2    # invariant operands: 1-buffered if possible

    weight_bytes = wmul * L * d_pad * d_pad * w_b
    use_streaming = (force_stream if force_stream is not None
                     else weight_bytes > 0.45 * budget)

    loss_out_bytes = 2 * 8 * 128 * 4        # double-buffered loss-partial block
    if not use_streaming:
        resident = weight_bytes + wmul * (L + 2) * d_pad * 4 + loss_out_bytes
        bytes_per_row = d_pad * (2 * in_b + 2 * out_b + 20)        # 2-buf io + live f32
    else:
        resident = (2 * (d_pad * d_pad * w_b + d_pad * 4)          # per-layer W/b, 2-buf
                    + wmul * 2 * d_pad * 4 + loss_out_bytes)
        bytes_per_row = d_pad * (2 * in_b + 2 * out_b + 2 * 4 + 16)  # + carry/sq scratch

    tm = _choose_row_tile(rows, bytes_per_row=bytes_per_row, resident_bytes=resident,
                          budget_bytes=budget, max_tm=max_rows_per_tile)
    num_tiles = rows // tm

    # ----- specs / grid -------------------------------------------------------
    kern = functools.partial(
        _streaming_encoder_kernel if use_streaming else _resident_encoder_kernel,
        num_layers=L, d_model=D, d_pad=d_pad, epsilon=float(epsilon),
        approx_recip=approx_recip)

    out_shapes = (jax.ShapeDtypeStruct((rows, d_pad), out_dtype),
                  jax.ShapeDtypeStruct((num_tiles, 8, 128), jnp.float32))

    if not use_streaming:
        grid = (num_tiles,)
        in_specs = [
            pl.BlockSpec((tm, d_pad), lambda i: (i, 0)),              # activation tile
            _invariant_spec((L, d_pad, d_pad), lambda i: (0, 0, 0)),  # weights (resident)
            _invariant_spec((L, 1, d_pad), lambda i: (0, 0, 0)),      # biases
            _invariant_spec((1, d_pad), lambda i: (0, 0)),            # LN alpha
            _invariant_spec((1, d_pad), lambda i: (0, 0)),            # LN bias
        ]
        out_specs = (pl.BlockSpec((tm, d_pad), lambda i: (i, 0)),
                     pl.BlockSpec((1, 8, 128), lambda i: (i, 0, 0)))
        scratch = []
        dims = ("parallel",)
    else:
        grid = (num_tiles, L)               # layer (carried) axis innermost
        in_specs = [
            pl.BlockSpec((tm, d_pad), lambda i, l: (i, 0)),
            pl.BlockSpec((1, d_pad, d_pad), lambda i, l: (l, 0, 0)),  # stream 1 layer
            pl.BlockSpec((1, 1, d_pad), lambda i, l: (l, 0, 0)),
            _invariant_spec((1, d_pad), lambda i, l: (0, 0)),
            _invariant_spec((1, d_pad), lambda i, l: (0, 0)),
        ]
        out_specs = (pl.BlockSpec((tm, d_pad), lambda i, l: (i, 0)),
                     pl.BlockSpec((1, 8, 128), lambda i, l: (i, 0, 0)))
        scratch = [pltpu.VMEM((tm, d_pad), jnp.float32),   # activation carry
                   pltpu.VMEM((tm, d_pad), jnp.float32)]   # y*y accumulator
        dims = ("parallel", "arbitrary")

    out2d, loss_parts = pl.pallas_call(
        kern,
        out_shape=out_shapes,
        grid=grid,
        in_specs=in_specs,
        out_specs=out_specs,
        scratch_shapes=scratch,
        compiler_params=pltpu.CompilerParams(
            dimension_semantics=dims, vmem_limit_bytes=vmem_limit),
    )(x2d, w_stack, b_stack, alpha, beta)

    # Tiny final reduction in JAX: sum of per-tile partials / (rows * D).
    loss = jnp.sum(loss_parts[:, 0, 0]) / jnp.float32(rows * D)
    out2d = out2d[:, :D] if d_pad != D else out2d
    return out2d.reshape(B, S, D), loss


# ---------------------------------------------------------------------------
# Pure-JAX reference (validation)
# ---------------------------------------------------------------------------
def _reference_forward(x, layer_params, norm_alpha, norm_bias, epsilon=1e-6):
    y = x.astype(jnp.float32)
    loss = None
    for (w, b) in layer_params:
        y = y + jnp.einsum("bsd,de->bse", y, w.astype(jnp.float32),
                           precision=jax.lax.Precision.HIGHEST) + b.astype(jnp.float32)
        layer_loss = jnp.mean(y * y)
        loss = layer_loss if loss is None else loss + layer_loss
    mean = jnp.mean(y, axis=-1, keepdims=True)
    var = jnp.sum((y - mean) ** 2, axis=-1, keepdims=True) / (y.shape[-1] - 1)
    out = norm_alpha * (y - mean) / (jnp.sqrt(var) + epsilon) + norm_bias
    return out, loss


# ---------------------------------------------------------------------------
# Demo
# ---------------------------------------------------------------------------
if __name__ == "__main__":
    B, S, D = 2, 64, 32          # rows = 128 -> >=2 row tiles (exercises the grid)
    n_layers = 2

    key = jax.random.PRNGKey(0)
    kx, *kls = jax.random.split(key, 1 + 2 * n_layers)
    x = jax.random.normal(kx, (B, S, D), dtype=jnp.float32)

    layer_params = []
    for li in range(n_layers):
        w = jax.random.normal(kls[2 * li], (D, D), dtype=jnp.float32) * 0.05
        b = jax.random.normal(kls[2 * li + 1], (D,), dtype=jnp.float32) * 0.01
        layer_params.append((w, b))

    norm_alpha = jnp.ones((D,), dtype=jnp.float32)
    norm_bias = jnp.zeros((D,), dtype=jnp.float32)

    # 1) Fast path: bf16 MXU inputs, approx reciprocal, weights VMEM-resident.
    out, loss = original_encoder_forward(x, layer_params, norm_alpha, norm_bias)
    out = jax.block_until_ready(out)
    loss = jax.block_until_ready(loss)
    assert out.shape == (B, S, D) and loss.shape == ()
    assert bool(jnp.all(jnp.isfinite(out))) and bool(jnp.isfinite(loss))

    # 2) Validation path (f32 matmul, exact reciprocal) vs pure-JAX reference.
    out_x, loss_x = original_encoder_forward(
        x, layer_params, norm_alpha, norm_bias,
        use_bf16_matmul=False, approx_recip=False)
    ref_out, ref_loss = _reference_forward(x, layer_params, norm_alpha, norm_bias)
    assert jnp.allclose(out_x, ref_out, atol=2e-2, rtol=2e-2)
    assert jnp.allclose(loss_x, ref_loss, atol=2e-2, rtol=2e-2)
    assert jnp.allclose(out, ref_out, atol=1e-1, rtol=1e-1)

    # 3) Weight-streaming fallback (v7x large L*D^2 regime) vs resident path.
    out_s, loss_s = original_encoder_forward(
        x, layer_params, norm_alpha, norm_bias,
        use_bf16_matmul=False, approx_recip=False, force_stream=True)
    assert jnp.allclose(out_s, out_x, atol=1e-4, rtol=1e-4)
    assert jnp.allclose(loss_s, loss_x, atol=1e-4, rtol=1e-4)

    print("KERNEL_OK")
</pallas_src>

<mosaic_0001>
module attributes {stable_mosaic.version = 11 : i64} {
  func.func @_resident_encoder_kernel(%arg0: i32, %arg1: memref<64x128xf32, #tpu.memory_space<vmem>>, %arg2: memref<2x128x128xbf16, #tpu.memory_space<vmem>>, %arg3: memref<2x1x128xf32, #tpu.memory_space<vmem>>, %arg4: memref<1x128xf32, #tpu.memory_space<vmem>>, %arg5: memref<1x128xf32, #tpu.memory_space<vmem>>, %arg6: memref<64x128xf32, #tpu.memory_space<vmem>>, %arg7: memref<1x8x128xf32, #tpu.memory_space<vmem>>) attributes {dimension_semantics = [#tpu.dimension_semantics<parallel>], iteration_bounds = array<i64: 2>, scalar_prefetch = 0 : i64, scratch_operands = 0 : i64, tpu.core_type = #tpu.core_type<tc>, window_params = [{transform_indices = @transform_0, window_bounds = array<i64: 64, 128>}, {pipeline_mode = #tpu.pipeline_mode<synchronous>, transform_indices = @transform_1, window_bounds = array<i64: 2, 128, 128>}, {pipeline_mode = #tpu.pipeline_mode<synchronous>, transform_indices = @transform_2, window_bounds = array<i64: 2, 1, 128>}, {pipeline_mode = #tpu.pipeline_mode<synchronous>, transform_indices = @transform_3, window_bounds = array<i64: 1, 128>}, {pipeline_mode = #tpu.pipeline_mode<synchronous>, transform_indices = @transform_4, window_bounds = array<i64: 1, 128>}, {transform_indices = @transform_5, window_bounds = array<i64: 64, 128>}, {transform_indices = @transform_6, window_bounds = array<i64: 1, 8, 128>}]} {
    %c0 = arith.constant 0 : index
    %c0_0 = arith.constant 0 : index
    %0 = vector.load %arg1[%c0, %c0_0] : memref<64x128xf32, #tpu.memory_space<vmem>>, vector<64x128xf32>
    %cst = arith.constant 0.000000e+00 : f32
    %1 = vector.broadcast %cst : f32 to vector<64x128xf32>
    %2 = arith.truncf %0 : vector<64x128xf32> to vector<64x128xbf16>
    %c0_1 = arith.constant 0 : index
    %c0_2 = arith.constant 0 : index
    %c0_3 = arith.constant 0 : index
    %3 = vector.load %arg2[%c0_1, %c0_2, %c0_3] : memref<2x128x128xbf16, #tpu.memory_space<vmem>>, vector<1x128x128xbf16>
    %4 = vector.shape_cast %3 : vector<1x128x128xbf16> to vector<128x128xbf16>
    %cst_4 = arith.constant dense<0.000000e+00> : vector<64x128xf32>
    %5 = tpu.matmul %2, %4, %cst_4 {dimension_numbers = #tpu.dot_dimension_numbers<[1], [0], [0], [1], [0, 0, 1, 1], [], []>} : vector<64x128xbf16>, vector<128x128xbf16>, vector<64x128xf32> -> vector<64x128xf32>
    %6 = arith.addf %0, %5 : vector<64x128xf32>
    %c0_5 = arith.constant 0 : index
    %c0_6 = arith.constant 0 : index
    %c0_7 = arith.constant 0 : index
    %7 = vector.load %arg3[%c0_5, %c0_6, %c0_7] : memref<2x1x128xf32, #tpu.memory_space<vmem>>, vector<1x1x128xf32>
    %8 = vector.shape_cast %7 : vector<1x1x128xf32> to vector<1x128xf32>
    %9 = vector.broadcast %8 : vector<1x128xf32> to vector<64x128xf32>
    %10 = arith.addf %6, %9 : vector<64x128xf32>
    %11 = arith.mulf %10, %10 : vector<64x128xf32>
    %12 = arith.addf %1, %11 : vector<64x128xf32>
    %13 = arith.truncf %10 : vector<64x128xf32> to vector<64x128xbf16>
    %c1 = arith.constant 1 : index
    %c0_8 = arith.constant 0 : index
    %c0_9 = arith.constant 0 : index
    %14 = vector.load %arg2[%c1, %c0_8, %c0_9] : memref<2x128x128xbf16, #tpu.memory_space<vmem>>, vector<1x128x128xbf16>
    %15 = vector.shape_cast %14 : vector<1x128x128xbf16> to vector<128x128xbf16>
    %cst_10 = arith.constant dense<0.000000e+00> : vector<64x128xf32>
    %16 = tpu.matmul %13, %15, %cst_10 {dimension_numbers = #tpu.dot_dimension_numbers<[1], [0], [0], [1], [0, 0, 1, 1], [], []>} : vector<64x128xbf16>, vector<128x128xbf16>, vector<64x128xf32> -> vector<64x128xf32>
    %17 = arith.addf %10, %16 : vector<64x128xf32>
    %c1_11 = arith.constant 1 : index
    %c0_12 = arith.constant 0 : index
    %c0_13 = arith.constant 0 : index
    %18 = vector.load %arg3[%c1_11, %c0_12, %c0_13] : memref<2x1x128xf32, #tpu.memory_space<vmem>>, vector<1x1x128xf32>
    %19 = vector.shape_cast %18 : vector<1x1x128xf32> to vector<1x128xf32>
    %20 = vector.broadcast %19 : vector<1x128xf32> to vector<64x128xf32>
    %21 = arith.addf %17, %20 : vector<64x128xf32>
    %22 = arith.mulf %21, %21 : vector<64x128xf32>
    %23 = arith.addf %12, %22 : vector<64x128xf32>
    %c0_14 = arith.constant 0 : index
    %c0_15 = arith.constant 0 : index
    %24 = vector.load %arg4[%c0_14, %c0_15] : memref<1x128xf32, #tpu.memory_space<vmem>>, vector<1x128xf32>
    %c0_16 = arith.constant 0 : index
    %c0_17 = arith.constant 0 : index
    %25 = vector.load %arg5[%c0_16, %c0_17] : memref<1x128xf32, #tpu.memory_space<vmem>>, vector<1x128xf32>
    %cst_18 = arith.constant dense<0.000000e+00> : vector<64xf32>
    %26 = vector.multi_reduction <add>, %21, %cst_18 [1] : vector<64x128xf32> to vector<64xf32>
    %27 = vector.shape_cast %26 : vector<64xf32> to vector<64x1xf32>
    %cst_19 = arith.constant 3.125000e-02 : f32
    %28 = vector.broadcast %cst_19 : f32 to vector<64x1xf32>
    %29 = arith.mulf %27, %28 : vector<64x1xf32>
    %30 = vector.broadcast %29 : vector<64x1xf32> to vector<64x128xf32>
    %31 = arith.subf %21, %30 : vector<64x128xf32>
    %32 = tpu.iota {dimensions = array<i32: 1>} : vector<1x128xi32>
    %c32_i32 = arith.constant 32 : i32
    %33 = vector.broadcast %c32_i32 : i32 to vector<1x128xi32>
    %34 = arith.cmpi slt, %32, %33 : vector<1x128xi32>
    %cst_20 = arith.constant 0.000000e+00 : f32
    %35 = vector.shape_cast %34 : vector<1x128xi1> to vector<1x128xi1>
    %36 = vector.broadcast %35 : vector<1x128xi1> to vector<64x128xi1>
    %37 = vector.broadcast %cst_20 : f32 to vector<64x128xf32>
    %38 = arith.select %36, %31, %37 : vector<64x128xi1>, vector<64x128xf32>
    %39 = arith.mulf %38, %38 : vector<64x128xf32>
    %cst_21 = arith.constant dense<0.000000e+00> : vector<64xf32>
    %40 = vector.multi_reduction <add>, %39, %cst_21 [1] : vector<64x128xf32> to vector<64xf32>
    %41 = vector.shape_cast %40 : vector<64xf32> to vector<64x1xf32>
    %cst_22 = arith.constant 0.0322580636 : f32
    %42 = vector.broadcast %cst_22 : f32 to vector<64x1xf32>
    %43 = arith.mulf %41, %42 : vector<64x1xf32>
    %44 = math.sqrt %43 : vector<64x1xf32>
    %cst_23 = arith.constant 9.99999997E-7 : f32
    %45 = vector.broadcast %cst_23 : f32 to vector<64x1xf32>
    %46 = arith.addf %44, %45 : vector<64x1xf32>
    %47 = tpu.reciprocal %46 {approx = true} : vector<64x1xf32> -> vector<64x1xf32>
    %48 = vector.broadcast %24 : vector<1x128xf32> to vector<64x128xf32>
    %49 = arith.mulf %48, %31 : vector<64x128xf32>
    %50 = vector.broadcast %47 : vector<64x1xf32> to vector<64x128xf32>
    %51 = arith.mulf %49, %50 : vector<64x128xf32>
    %52 = vector.broadcast %25 : vector<1x128xf32> to vector<64x128xf32>
    %53 = arith.addf %51, %52 : vector<64x128xf32>
    %c0_24 = arith.constant 0 : index
    %c0_25 = arith.constant 0 : index
    %54 = vector.load %arg6[%c0_24, %c0_25] : memref<64x128xf32, #tpu.memory_space<vmem>>, vector<64x128xf32>
    tpu.vector_store %arg6[%c0_24, %c0_25], %53 {strides = array<i32>} : memref<64x128xf32, #tpu.memory_space<vmem>>, vector<64x128xf32>,
    %55 = vector.shape_cast %23 : vector<64x128xf32> to vector<1x64x128xf32>
    %cst_26 = arith.constant dense<0.000000e+00> : vector<1xf32>
    %56 = vector.multi_reduction <add>, %55, %cst_26 [1, 2] : vector<1x64x128xf32> to vector<1xf32>
    %57 = vector.shape_cast %56 : vector<1xf32> to vector<1x1x1xf32>
    %58 = vector.extract %57[0, 0, 0] : f32 from vector<1x1x1xf32>
    %59 = vector.broadcast %58 : f32 to vector<1x8x128xf32>
    %c0_27 = arith.constant 0 : index
    %c0_28 = arith.constant 0 : index
    %c0_29 = arith.constant 0 : index
    %60 = vector.load %arg7[%c0_27, %c0_28, %c0_29] : memref<1x8x128xf32, #tpu.memory_space<vmem>>, vector<1x8x128xf32>
    tpu.vector_store %arg7[%c0_27, %c0_28, %c0_29], %59 {strides = array<i32>} : memref<1x8x128xf32, #tpu.memory_space<vmem>>, vector<1x8x128xf32>,
    return
  }
  func.func @transform_0(%arg0: i32) -> (i32, i32) {
    %c0_i32 = arith.constant 0 : i32
    %c0_i32_0 = arith.constant 0 : i32
    return %arg0, %c0_i32 : i32, i32
  }
  func.func @transform_1(%arg0: i32) -> (i32, i32, i32) {
    %c0_i32 = arith.constant 0 : i32
    %c0_i32_0 = arith.constant 0 : i32
    %c0_i32_1 = arith.constant 0 : i32
    %c0_i32_2 = arith.constant 0 : i32
    return %c0_i32, %c0_i32_0, %c0_i32_1 : i32, i32, i32
  }
  func.func @transform_2(%arg0: i32) -> (i32, i32, i32) {
    %c0_i32 = arith.constant 0 : i32
    %c0_i32_0 = arith.constant 0 : i32
    %c0_i32_1 = arith.constant 0 : i32
    %c0_i32_2 = arith.constant 0 : i32
    return %c0_i32, %c0_i32_0, %c0_i32_1 : i32, i32, i32
  }
  func.func @transform_3(%arg0: i32) -> (i32, i32) {
    %c0_i32 = arith.constant 0 : i32
    %c0_i32_0 = arith.constant 0 : i32
    %c0_i32_1 = arith.constant 0 : i32
    return %c0_i32, %c0_i32_0 : i32, i32
  }
  func.func @transform_4(%arg0: i32) -> (i32, i32) {
    %c0_i32 = arith.constant 0 : i32
    %c0_i32_0 = arith.constant 0 : i32
    %c0_i32_1 = arith.constant 0 : i32
    return %c0_i32, %c0_i32_0 : i32, i32
  }
  func.func @transform_5(%arg0: i32) -> (i32, i32) {
    %c0_i32 = arith.constant 0 : i32
    %c0_i32_0 = arith.constant 0 : i32
    return %arg0, %c0_i32 : i32, i32
  }
  func.func @transform_6(%arg0: i32) -> (i32, i32, i32) {
    %c0_i32 = arith.constant 0 : i32
    %c0_i32_0 = arith.constant 0 : i32
    %c0_i32_1 = arith.constant 0 : i32
    return %arg0, %c0_i32, %c0_i32_0 : i32, i32, i32
  }
}

</mosaic_0001>

<bundles_post_ra>
// kernel: tpu_custom_call.1
= control target key start
LH: loop header
LB: loop body
LE: loop exit
PB: predicated region body
PF: predicated region fallthrough
CT: control target
= control target key end

     0   :  { %12 = vsyncpa [#allocation3], 0  ;;  %s1837_s0 = inlined_call_operand.hbm [shape: f32[128,128], index: 0, kind: input, shape index: {}]   ;;  %s1838_s1 = inlined_call_operand.hbm [shape: bf16[2,128,128], index: 1, kind: input, shape index: {}]   ;;  %s1839_s2 = inlined_call_operand.vmem [shape: f32[2,1,128], index: 2, kind: input, shape index: {}]   ;;  %s1840_s3 = inlined_call_operand.vmem [shape: f32[1,128], index: 3, kind: input, shape index: {}]   ;;  %s1841_s4 = inlined_call_operand.vmem [shape: f32[1,128], index: 4, kind: input, shape index: {}]   ;;  %s1842_s5 = inlined_call_operand.hbm [shape: f32[128,128], index: 5, kind: output, shape index: {0}]   ;;  %s1843_s6 = inlined_call_operand.hbm [shape: f32[2,8,128], index: 6, kind: output, shape index: {1}]  }
   0x1   :  { %14 = vsyncpa [#allocation3 + $0x1], 0 }
   0x2   :  { %15 = vsyncpa [#allocation6], 0 }
   0x3   :  { %16 = vsyncpa [#allocation4], 0 }
   0x4   :  { %18 = vsyncpa [#allocation4 + $0x1], 0 }
   0x5   :  { %19 = vsyncpa [#allocation9], 0 }
   0x6   :  { %21 = vsyncpa [#allocation9 + $0x1], 0  ;;  %s1452_s21 = smov 0   ;;  %s1454_s22 = smov 0  }
   0x7   :  { %s1456_s23 = smov 0   ;;  %s1458_s24 = smov 0  }
   0x8 LB: > { %s1473_s25 = sadd.s32 4294967295, %s1405_s24   ;;  %s1013_s26 = sadd.s32 4294967294, %s1405_s24   ;;  %s1405_s24 = sphi %s1458_s24, %s1863_s24   ;;  %s1401_s23 = sphi %s1456_s23, %s1862_s23   ;;  %s1397_s22 = sphi %s1454_s22, %s1861_s22   ;;  %s1393_s21 = sphi %s1452_s21, %s1860_s21  }
   0x9   : > { %p47_p0 = scmp.ne.s32.totalorder %s1397_s22, %s1393_s21  ;;  %p1844_p1 = scmp.eq.s32.totalorder %s1473_s25, 0 }
   0xa   : > { %p161_p3 = scmp.eq.s32.totalorder %s1013_s26, 1  ;;  %p1014_p5 = scmp.ge.s32.totalorder %s1405_s24, 1 }
   0xb   : > { %p1482_p4 = por %p1844_p1, %p47_p0  ;;  %p194_p7 = scmp.lt.s32.totalorder %s1405_s24, 3 }
   0xc   : > { %p1487_p6 = por %p161_p3, %p47_p0  ;;  %s1407_s30 = smov [#allocation5]  }
   0xd   : > { %s1847_s27 = scalar_select %p1482_p4, 1, 0 }
   0xe   : > { %s1848_s28 = scalar_select %p1487_p6, 1, 0 }
   0xf   : > { %p1492_p8 = pnand %p1014_p5, %p194_p7  ;;  %s206_s7 = sshll.u32 %s1407_s30, 4  ;;  %s1496_s7 = int_to_ptr.vmem [resolvable:$true] %s206_s7 }
  0x10   : > { %s1508_s9 = sadd.s32 1, %s1405_s24   ;;  %s34_s10 = sadd.s32 1, %s1401_s23 }
  0x11   : > { %s1849_s29 = scalar_select %p1492_p8, 1, 0 }
  0x12   : > { %p1139_p9 = pneg %p1492_p8  ;;  %s31_s11 = ssub.s32 %s1405_s24, %s1508_s9 }
  0x13   : > { %s1245_s14 = scalar_lea.hbm %s1838_s1, 2048 }
  0x14   : > { %p1503_p11 = pnand %p1139_p9, %p1844_p1  ;;  %p1246_p12 = scmp.ne.s32.totalorder %s1838_s1, %s1245_s14 }
  0x15   : > { %p1252_p5 = scmp.lt.u32.totalorder %s1245_s14, %s1838_s1 }
  0x16   : > { %p1247_p13 = pneg %p1503_p11 }
  0x18   : > { %p1248_p0 = pnand %p1247_p13, %p1246_p12 }
  0x1a   : > { %p1249_p3 = pneg %p1248_p0 }
  0x1c   : > { %p1254_p7 = pnand %p1252_p5, %p1249_p3 }
  0x1e   : > { %1257 = shalt.err (!%p1254_p7)
}
  0x1f   : > { %s1258_s19 = scalar_lea.vmem %s1496_s7, 2048  ;;  %p1266_p2 = scmp.lt.s32.totalorder %s1496_s7, %s1496_s7 }
  0x20   : > { %p1259_p9 = scmp.ne.s32.totalorder %s1496_s7, %s1258_s19  ;;  %p1267_p6 = scmp.lt.s32.totalorder %s1258_s19, %s1258_s19 }
  0x22   : > { %p1261_p10 = pnand %p1259_p9, %p1247_p13  ;;  %p1268_p4 = por %p1267_p6, %p1266_p2 }
  0x24   : > { %p1262_p1 = pneg %p1261_p10 }
  0x26   : > { %p1269_p8 = pnand %p1268_p4, %p1262_p1 }
  0x28   : > { %1272 = shalt.err (!%p1269_p8)
}
  0x29   : > { %s1408_s20 = smov 64   ;;  %s1409_s26 = smov 4  }
  0x2a   : > { %1142 = dma.hbm_to_vmem [thread:$0]  (!%p1503_p11), %s1838_s1, 2048, %s1496_s7, [#allocation6], %s1408_s20, %s1408_s20, %s1409_s26  }
  0x2b   : > { %p32_p2 = scmp.eq.s32.totalorder %s31_s11, 0  ;;  %p41_p1 = scmp.ne.s32.totalorder %s1401_s23, %s1397_s22 }
  0x2c   : > { %p42_p4 = scmp.eq.s32.totalorder %s1405_s24, 0  ;;  %p1155_p6 = scmp.lt.s32.totalorder %s1405_s24, 2 }
  0x2d   : > { %s1539_s13 = scalar_select %p32_p2, %s1401_s23, %s34_s10  }
  0x2e   : > { %p43_p8 = por %p42_p4, %p41_p1  ;;  %p1851_p10 = scmp.eq.s32.totalorder %s1473_s25, 1 }
  0x2f   : > { %s229_s15 = sand.u32 1, %s1401_s23   ;;  %s1053_s16 = sshll.u32 %s1405_s24, 10 }
  0x30   : > { %p1543_p12 = por %p1851_p10, %p41_p1  ;;  %s1017_s17 = sshll.u32 %s229_s15, 6 }
  0x31   : > { %s1552_s19 = scalar_lea.hbm %s1837_s0, %s1053_s16  ;;  %s233_s7 = scalar_lea.vmem [#allocation2], %s1017_s17 }
  0x32   : > { %s240_s10 = sshll.u32 %s233_s7, 4  ;;  %p1554_p11 = pnand %p1155_p6, %p43_p8  ;;  %s1558_s10 = int_to_ptr.vmem [resolvable:$true] %s240_s10 }
  0x33   : > { %s1560_s20 = scalar_lea.sflag [#allocation3], %s229_s15  ;;  %s1273_s26 = scalar_lea.hbm %s1552_s19, 1024 }
  0x34   : > { %p1274_p13 = scmp.ne.s32.totalorder %s1552_s19, %s1273_s26  ;;  %p1275_p0 = pneg %p1554_p11 }
  0x35   : > { %s1278_s16 = scalar_lea.hbm %s1837_s0, 2048  ;;  %p1279_p7 = scmp.lt.u32.totalorder %s1552_s19, %s1837_s0 }
  0x36   : > { %p1276_p3 = pnand %p1275_p0, %p1274_p13  ;;  %p1280_p9 = scmp.lt.u32.totalorder %s1278_s16, %s1273_s26 }
  0x37   : > { %p1282_p1 = scmp.lt.u32.totalorder %s1273_s26, %s1552_s19 }
  0x38   : > { %p1277_p5 = pneg %p1276_p3  ;;  %p1281_p2 = por %p1280_p9, %p1279_p7 }
  0x3a   : > { %p1283_p4 = por %p1282_p1, %p1281_p2 }
  0x3c   : > { %p1284_p6 = pnand %p1283_p4, %p1277_p5 }
  0x3e   : > { %1287 = shalt.err (!%p1284_p6)
}
  0x3f   : > { %s1288_s15 = scalar_lea.vmem %s1558_s10, 1024  ;;  %s1410_s18 = smov [#allocation2]  }
  0x40   : > { %p1289_p8 = scmp.ne.s32.totalorder %s1558_s10, %s1288_s15  ;;  %s1293_s7 = sshll.u32 %s1410_s18, 4  ;;  %s1294_s7 = int_to_ptr.vmem [resolvable:$false] %s1293_s7 }
  0x41   : > { %s1295_s30 = scalar_lea.vmem %s1294_s7, 2048  ;;  %p1296_p3 = scmp.lt.s32.totalorder %s1558_s10, %s1294_s7 }
  0x42   : > { %p1291_p10 = pnand %p1289_p8, %p1275_p0  ;;  %p1297_p7 = scmp.lt.s32.totalorder %s1295_s30, %s1288_s15 }
  0x44   : > { %p1292_p13 = pneg %p1291_p10  ;;  %p1298_p9 = por %p1297_p7, %p1296_p3 }
  0x46   : > { %p1299_p2 = pnand %p1298_p9, %p1292_p13 }
  0x48   : > { %1302 = shalt.err (!%p1299_p2)
}
  0x49   : > { %s1411_s26 = smov 128   ;;  %s1412_s12 = smov 8  }
  0x4a   : > { %1146 = dma.hbm_to_vmem [thread:$0]  (!%p1554_p11), %s1552_s19, 1024, %s1558_s10, %s1560_s20, %s1411_s26, %s1411_s26, %s1412_s12  }
  0x4b   : > { %p1854_p0 = scmp.ne.s32.totalorder %s1849_s29, 0 }
  0x4c   : > { %s1591_s16 = sand.u32 (!%p1854_p0), 1, %s1397_s22   ;;  %p1855_p5 = scmp.ne.s32.totalorder (!%p1854_p0), %s1847_s27, 0 }
  0x4d   : > { %252 = sbr.rel (%p1854_p0) target bundleno = 915 (0x393), region = 40  ;;  %s1021_s17 = sshll.u32 (!%p1854_p0), %s1591_s16, 6 }
  0x4e   : > { %s255_s8 = scalar_lea.sflag (!%p1854_p0), [#allocation3], %s1591_s16  ;;  %s1597_s15 = scalar_lea.vmem (!%p1854_p0), [#allocation2], %s1021_s17 }
  0x54   : > { %1376 = dma.done.wait (%p1855_p5), %s255_s8, 1024  }
  0x55   : > { %1378 = vsyncadd (%p1855_p5), %s255_s8, 4294966272  ;;  %p1856_p11 = scmp.eq.s32.totalorder %s1473_s25, 0 }
  0x57   : > { %1380 = dma.done.wait (%p1856_p11), [#allocation6], 2048   ;;  %p1857_p1 = pmov %p1856_p11 }
  0x58   : > { %v1197_v0 = vld [vmem:[#allocation5] sm:$0xff]   ;;  %v1198_v1 = vld [vmem:[#allocation5 + $0x8] sm:$0xff]   ;;  %v1199_v2 = vld [vmem:[#allocation5 + $0x10] sm:$0xff]   ;;  %s1024_s11 = sshll.u32 %s1591_s16, 3  ;;  %s1050_s7 = sshll.u32 %s1473_s25, 7 }
  0x59   : > { %1382 = vsyncadd (%p1857_p1), [#allocation6], 4294965248  ;;  %1079 = vmatprep.subr.bf16.mxu0 %v1197_v0  ;;  %v1200_v3 = vld [vmem:[#allocation5 + $0x18] sm:$0xff]   ;;  %v299_v4 = vld [vmem:[%s1597_s15] sm:$0xff]  ;;  %s295_s20 = scalar_lea.vmem [#allocation8], %s1024_s11  ;;  %s1702_s8 = scalar_lea.hbm %s1843_s6, %s1050_s7 }
  0x5a   : > { %1080 = vmatpush3.bf16.msra.mxu0 %v1197_v0  ;;  %v300_v5 = vld [vmem:[%s1597_s15 + $0x8] sm:$0xff]  ;;  %v1201_v7 = vld [vmem:[#allocation5 + $0x20] sm:$0xff]   ;;  %v1207_v10 = vld [vmem:[#allocation5 + $0x50] sm:$0xff]   ;;  %s901_s18 = sshll.u32 %s295_s20, 4  ;;  %s1413_s29 = smov [#allocation8]   ;;  %s1697_s18 = int_to_ptr.vmem [resolvable:$true] %s901_s18 }
  0x5b   : > { %1081 = vmatprep.subr.bf16.mxu0 %v1198_v1  ;;  %v307_v6 = vpack.c.bf16 %v300_v5, %v299_v4  ;;  %v1205_v8 = vld [vmem:[#allocation5 + $0x40] sm:$0xff]   ;;  %v1206_v9 = vld [vmem:[#allocation5 + $0x48] sm:$0xff]   ;;  %v1208_v12 = vld [vmem:[#allocation5 + $0x58] sm:$0xff]   ;;  %s1303_s27 = scalar_lea.vmem %s1697_s18, 128  ;;  %s1307_s19 = sshll.u32 %s1413_s29, 4  ;;  %s1308_s19 = int_to_ptr.vmem [resolvable:$false] %s1307_s19 }
  0x5c   : > { %1103 = vmatprep.subr.bf16.mxu1 %v1205_v8  ;;  %v1202_v11 = vld [vmem:[#allocation5 + $0x28] sm:$0xff]   ;;  %v1203_v13 = vld [vmem:[#allocation5 + $0x30] sm:$0xff]   ;;  %v1209_v14 = vld [vmem:[#allocation5 + $0x60] sm:$0xff]   ;;  %p1304_p4 = scmp.ne.s32.totalorder %s1697_s18, %s1303_s27  ;;  %s1309_s10 = scalar_lea.vmem %s1308_s19, 256 }
  0x5d   : > { %1095 = vmatprep.mubr.bf16.mxu0 %v307_v6  ;;  %1104 = vmatpush3.bf16.msra.mxu1 %v1205_v8  ;;  %v1204_v15 = vld [vmem:[#allocation5 + $0x38] sm:$0xff]   ;;  %v301_v16 = vld [vmem:[%s1597_s15 + $0x10] sm:$0xff]  ;;  %v1210_v18 = vld [vmem:[#allocation5 + $0x68] sm:$0xff]   ;;  %p1310_p10 = scmp.lt.s32.totalorder %s1697_s18, %s1308_s19  ;;  %p1311_p13 = scmp.lt.s32.totalorder %s1309_s10, %s1303_s27 }
  0x5e   : > { %1082 = vmatpush3.bf16.msra.mxu0 %v1198_v1  ;;  %1105 = vmatprep.subr.bf16.mxu1 %v1206_v9  ;;  %v302_v17 = vld [vmem:[%s1597_s15 + $0x18] sm:$0xff]  ;;  %v303_v19 = vld [vmem:[%s1597_s15 + $0x20] sm:$0xff]  ;;  %v304_v20 = vld [vmem:[%s1597_s15 + $0x28] sm:$0xff]  ;;  %p1305_p6 = pnand %p1304_p4, %p1543_p12 }
  0x5f   : > { %1083 = vmatprep.subr.bf16.mxu0 %v1199_v2  ;;  %v308_v21 = vpack.c.bf16 %v302_v17, %v301_v16  ;;  %v309_v22 = vpack.c.bf16 %v304_v20, %v303_v19  ;;  %v305_v23 = vld [vmem:[%s1597_s15 + $0x30] sm:$0xff]  ;;  %v306_v24 = vld [vmem:[%s1597_s15 + $0x38] sm:$0xff]  ;;  %v1033_v33 = vld [vmem:[%s1839_s2] ss:$0 sm:$0xff]  ;;  %s872_s15 = scalar_lea.sflag [#allocation9], %s1591_s16  ;;  %p1312_p3 = por %p1311_p13, %p1310_p10 }
  0x60   : > { %v310_v25 = vpack.c.bf16 %v306_v24, %v305_v23  ;;  %v1211_v26 = vld [vmem:[#allocation5 + $0x70] sm:$0xff]   ;;  %v1212_v27 = vld [vmem:[#allocation5 + $0x78] sm:$0xff]   ;;  %v1043_v58 = vld [vmem:[%s1839_s2 + $0x1] ss:$0 sm:$0xff]  ;;  %p1306_p8 = pneg %p1305_p6 }
  0x61   : > { %1106 = vmatpush3.bf16.msra.mxu1 %v1206_v9 }
  0x62   : > { %1084 = vmatpush3.bf16.msra.mxu0 %v1199_v2  ;;  %1107 = vmatprep.subr.bf16.mxu1 %v1207_v10  ;;  %p1313_p7 = pnand %p1312_p3, %p1306_p8 }
  0x63   : > { %1085 = vmatprep.subr.bf16.mxu0 %v1200_v3 }
  0x65   : > { %1108 = vmatpush3.bf16.msra.mxu1 %v1207_v10 }
  0x66   : > { %1086 = vmatpush3.bf16.msra.mxu0 %v1200_v3  ;;  %1109 = vmatprep.subr.bf16.mxu1 %v1208_v12 }
  0x67   : > { %1087 = vmatprep.subr.bf16.mxu0 %v1201_v7 }
  0x69   : > { %1110 = vmatpush3.bf16.msra.mxu1 %v1208_v12 }
  0x6a   : > { %1088 = vmatpush3.bf16.msra.mxu0 %v1201_v7  ;;  %1111 = vmatprep.subr.bf16.mxu1 %v1209_v14 }
  0x6b   : > { %1089 = vmatprep.subr.bf16.mxu0 %v1202_v11 }
  0x6d   : > { %1112 = vmatpush3.bf16.msra.mxu1 %v1209_v14 }
  0x6e   : > { %1090 = vmatpush3.bf16.msra.mxu0 %v1202_v11  ;;  %1113 = vmatprep.subr.bf16.mxu1 %v1210_v18 }
  0x6f   : > { %1091 = vmatprep.subr.bf16.mxu0 %v1203_v13 }
  0x71   : > { %1114 = vmatpush3.bf16.msra.mxu1 %v1210_v18 }
  0x72   : > { %1092 = vmatpush3.bf16.msra.mxu0 %v1203_v13  ;;  %1115 = vmatprep.subr.bf16.mxu1 %v1211_v26 }
  0x73   : > { %1093 = vmatprep.subr.bf16.mxu0 %v1204_v15 }
  0x75   : > { %1116 = vmatpush3.bf16.msra.mxu1 %v1211_v26 }
  0x76   : > { %1094 = vmatpush3.bf16.msra.mxu0 %v1204_v15  ;;  %1117 = vmatprep.subr.bf16.mxu1 %v1212_v27 }
  0x79   : > { %1096 = vmatmul.mubr.bf16.vlgmr.msra.gmra.mrb[0].mxu0 %v308_v21  ;;  %1118 = vmatpush3.bf16.msra.mxu1 %v1212_v27 }
  0x7a   : > { %1099 = vmatprep.mubr.bf16.mxu0 %v309_v22 }
  0x81   : > { %1100 = vmatmul.mubr.bf16.gmra.mrb[4].mxu0 %v310_v25 }
 0x14c   : > { %v1097_v28 = vpop.f32.mrb[0].mxu0 }
 0x14d   : > { %v409_v29 = vpop.f32.mrb[1].mxu0  ;;  %v442_v32 = vadd.f32 %v1097_v28, %v301_v16 }
 0x14e   : > { %v440_v30 = vadd.f32 %v409_v29, %v299_v4  ;;  %v1098_v31 = vpop.f32.mrb[2].mxu0 }
 0x14f   : > { %v443_v34 = vadd.f32 %v1098_v31, %v302_v17  ;;  %v412_v35 = vpop.f32.mrb[3].mxu0  ;;  %v457_v40 = vadd.f32 %v1033_v33, %v442_v32 }
 0x150   : > { %v441_v36 = vadd.f32 %v412_v35, %v300_v5  ;;  %v455_v38 = vadd.f32 %v1033_v33, %v440_v30 }
 0x151   : > { %v458_v37 = vadd.f32 %v1033_v33, %v443_v34  ;;  %v465_v12 = vmul.f32 %v457_v40, %v457_v40 }
 0x152   : > { %v456_v39 = vadd.f32 %v1033_v33, %v441_v36  ;;  %v463_v8 = vmul.f32 %v455_v38, %v455_v38 }
 0x153   : > { %v480_v45 = vpack.c.bf16 %v458_v37, %v457_v40 }
 0x154   : > { %v1101_v41 = vpop.f32.mrb[4].mxu0  ;;  %v479_v42 = vpack.c.bf16 %v456_v39, %v455_v38  ;;  %v464_v9 = vmul.f32 %v456_v39, %v456_v39 }
 0x155   : > { %v446_v43 = vadd.f32 %v1101_v41, %v305_v23  ;;  %v425_v44 = vpop.f32.mrb[5].mxu0 }
 0x156   : > { %v444_v46 = vadd.f32 %v425_v44, %v303_v19  ;;  %v1102_v47 = vpop.f32.mrb[6].mxu0  ;;  %1119 = vmatprep.mubr.bf16.mxu1 %v479_v42 }
 0x157   : > { %v447_v48 = vadd.f32 %v1102_v47, %v306_v24  ;;  %v428_v49 = vpop.f32.mrb[7].mxu0  ;;  %1120 = vmatmul.mubr.bf16.vlgmr.msra.gmra.mrb[0].mxu1 %v480_v45  ;;  %v461_v51 = vadd.f32 %v1033_v33, %v446_v43 }
 0x158   : > { %v445_v50 = vadd.f32 %v428_v49, %v304_v20  ;;  %v459_v53 = vadd.f32 %v1033_v33, %v444_v46  ;;  %v466_v20 = vmul.f32 %v458_v37, %v458_v37  ;;  %v687_v49 = vlaneseq }
 0x159   : > { %v1618_v52 = vadd.f32 %v1033_v33, %v447_v48 }
 0x15a   : > { %v460_v54 = vadd.f32 %v1033_v33, %v445_v50  ;;  %v467_v28 = vmul.f32 %v459_v53, %v459_v53  ;;  %v688_v50 = vand.u32 127, %v687_v49 }
 0x15b   : > { %v482_v56 = vpack.c.bf16 %v1618_v52, %v461_v51  ;;  %v470_v43 = vmul.f32 %v1618_v52, %v1618_v52 }
 0x15c   : > { %v481_v55 = vpack.c.bf16 %v460_v54, %v459_v53  ;;  %v468_v34 = vmul.f32 %v460_v54, %v460_v54  ;;  %vm689_vm0 = vcmp.lt.s32.totalorder %v688_v50, 32 }
 0x15e   : > { %1123 = vmatprep.mubr.bf16.mxu1 %v481_v55 }
 0x15f   : > { %1124 = vmatmul.mubr.bf16.gmra.mrb[4].mxu1 %v482_v56 }
 0x22a   : > { %v1121_v57 = vpop.f32.mrb[0].mxu1 }
 0x22b   : > { %v615_v59 = vadd.f32 %v1121_v57, %v457_v40  ;;  %v582_v60 = vpop.f32.mrb[1].mxu1 }
 0x22c   : > { %v613_v61 = vadd.f32 %v582_v60, %v455_v38  ;;  %v1122_v62 = vpop.f32.mrb[2].mxu1 }
 0x22d   : > { %v1624_v63 = vadd.f32 %v1043_v58, %v615_v59  ;;  %v616_v0 = vadd.f32 %v1122_v62, %v458_v37  ;;  %v585_v1 = vpop.f32.mrb[3].mxu1 }
 0x22e   : > { %v1626_v2 = vadd.f32 %v1043_v58, %v613_v61  ;;  %v614_v3 = vadd.f32 %v585_v1, %v456_v39  ;;  %v469_v39 = vmul.f32 %v461_v51, %v461_v51 }
 0x22f   : > { %v1628_v4 = vadd.f32 %v1043_v58, %v616_v0  ;;  %659 = vadd.xlane.f32.xlu1 %v1624_v63  ;;  %v639_v7 = vmul.f32 %v1624_v63, %v1624_v63 }
 0x230   : > { %v637_v5 = vmul.f32 %v1626_v2, %v1626_v2  ;;  %v1633_v6 = vadd.f32 %v1043_v58, %v614_v3  ;;  %655 = vadd.xlane.f32.xlu0 %v1626_v2 }
 0x231   : > { %v640_v13 = vmul.f32 %v1628_v4, %v1628_v4  ;;  %v647_v21 = vadd.f32 %v639_v7, %v465_v12 }
 0x232   : > { %v638_v10 = vmul.f32 %v1633_v6, %v1633_v6  ;;  %v1125_v11 = vpop.f32.mrb[4].mxu1  ;;  %v645_v16 = vadd.f32 %v637_v5, %v463_v8 }
 0x233   : > { %v619_v14 = vadd.f32 %v1125_v11, %v461_v51  ;;  %661 = vadd.xlane.f32.xlu1 %v1628_v4  ;;  %v598_v15 = vpop.f32.mrb[5].mxu1  ;;  %v648_v29 = vadd.f32 %v640_v13, %v466_v20 }
 0x234   : > { %v646_v17 = vadd.f32 %v638_v10, %v464_v9  ;;  %v617_v18 = vadd.f32 %v598_v15, %v459_v53  ;;  %657 = vadd.xlane.f32.xlu0 %v1633_v6  ;;  %v1126_v19 = vpop.f32.mrb[6].mxu1 }
 0x235   : > { %v620_v22 = vadd.f32 %v1126_v19, %v1618_v52  ;;  %v601_v23 = vpop.f32.mrb[7].mxu1  ;;  %v1645_v25 = vadd.f32 %v1043_v58, %v619_v14 }
 0x236   : > { %v848_v24 = vadd.f32 %v646_v17, %v645_v16  ;;  %v633_v26 = vadd.f32 %v1043_v58, %v617_v18  ;;  %v618_v27 = vadd.f32 %v601_v23, %v460_v54 }
 0x237   : > { %v1647_v31 = vadd.f32 %v1043_v58, %v620_v22  ;;  %v643_v35 = vmul.f32 %v1645_v25, %v1645_v25 }
 0x238   : > { %v641_v30 = vmul.f32 %v633_v26, %v633_v26  ;;  %v634_v32 = vadd.f32 %v1043_v58, %v618_v27  ;;  %663 = vadd.xlane.f32.xlu0 %v633_v26  ;;  %v849_v33 = vadd.f32 %v848_v24, %v647_v21 }
 0x239   : > { %v644_v40 = vmul.f32 %v1647_v31, %v1647_v31  ;;  %v651_v44 = vadd.f32 %v643_v35, %v469_v39 }
 0x23a   : > { %v649_v36 = vadd.f32 %v641_v30, %v467_v28  ;;  %v642_v37 = vmul.f32 %v634_v32, %v634_v32  ;;  %665 = vadd.xlane.f32.xlu1 %v634_v32  ;;  %v850_v38 = vadd.f32 %v849_v33, %v648_v29 }
 0x23b   : > { %v652_v46 = vadd.f32 %v644_v40, %v470_v43 }
 0x23c   : > { %667 = vadd.xlane.f32.xlu0 %v1645_v25  ;;  %v650_v41 = vadd.f32 %v642_v37, %v468_v34  ;;  %v851_v42 = vadd.f32 %v850_v38, %v649_v36 }
 0x23e   : > { %669 = vadd.xlane.f32.xlu1 %v1647_v31  ;;  %v852_v45 = vadd.f32 %v851_v42, %v650_v41 }
 0x240   : > { %v853_v47 = vadd.f32 %v852_v45, %v651_v44 }
 0x242   : > { %v854_v48 = vadd.f32 %v853_v47, %v652_v46 }
 0x244   : > { %855 = vadd.xlane.f32.xlu0 %v854_v48 }
 0x2bc   : > { %v660_v51 = vpop.xlane.xlu1 %659 }
 0x2bd   : > { %v673_v53 = vmul.f32 0.03125, %v660_v51  ;;  %v656_v54 = vpop.xlane.xlu0 %655 }
 0x2be   : > { %v671_v55 = vmul.f32 0.03125, %v656_v54 }
 0x2bf   : > { %v1658_v56 = vsub.f32 %v1624_v63, %v673_v53 }
 0x2c0   : > { %v1661_v57 = vsub.f32 %v1626_v2, %v671_v55  ;;  %v662_v52 = vpop.xlane.xlu1 %661 }
 0x2c1   : > { %v674_v58 = vmul.f32 0.03125, %v662_v52  ;;  %v658_v59 = vpop.xlane.xlu0 %657  ;;  %v694_v60 = vsel %vm689_vm0, %v1658_v56, 0.0 }
 0x2c2   : > { %v672_v61 = vmul.f32 0.03125, %v658_v59  ;;  %v702_v62 = vmul.f32 %v694_v60, %v694_v60  ;;  %v692_v1 = vsel %vm689_vm0, %v1661_v57, 0.0 }
 0x2c3   : > { %v1666_v0 = vsub.f32 %v1628_v4, %v674_v58  ;;  %v700_v7 = vmul.f32 %v692_v1, %v692_v1 }
 0x2c4   : > { %v1671_v63 = vsub.f32 %v1633_v6, %v672_v61  ;;  %712 = vadd.xlane.f32.xlu1 %v702_v62 }
 0x2c5   : > { %v664_v2 = vpop.xlane.xlu0 %663  ;;  %v695_v3 = vsel %vm689_vm0, %v1666_v0, 0.0 }
 0x2c6   : > { %v675_v5 = vmul.f32 0.03125, %v664_v2  ;;  %v703_v8 = vmul.f32 %v695_v3, %v695_v3  ;;  %v693_v10 = vsel %vm689_vm0, %v1671_v63, 0.0 }
 0x2c7   : > { %v666_v9 = vpop.xlane.xlu1 %665  ;;  %v701_v14 = vmul.f32 %v693_v10, %v693_v10 }
 0x2c8   : > { %v1677_v4 = vsub.f32 %v633_v26, %v675_v5  ;;  %v676_v11 = vmul.f32 0.03125, %v666_v9  ;;  %708 = vadd.xlane.f32.xlu1 %v700_v7  ;;  %714 = vadd.xlane.f32.xlu0 %v703_v8 }
 0x2c9   : > { %v668_v12 = vpop.xlane.xlu0 %667 }
 0x2ca   : > { %v1679_v6 = vsub.f32 %v634_v32, %v676_v11  ;;  %v677_v13 = vmul.f32 0.03125, %v668_v12  ;;  %v696_v15 = vsel %vm689_vm0, %v1677_v4, 0.0 }
 0x2cb   : > { %v670_v16 = vpop.xlane.xlu1 %669  ;;  %v704_v17 = vmul.f32 %v696_v15, %v696_v15 }
 0x2cc   : > { %v1684_v18 = vsub.f32 %v1645_v25, %v677_v13  ;;  %v678_v19 = vmul.f32 0.03125, %v670_v16  ;;  %710 = vadd.xlane.f32.xlu0 %v701_v14  ;;  %v697_v20 = vsel %vm689_vm0, %v1679_v6, 0.0 }
 0x2cd   : > { %716 = vadd.xlane.f32.xlu1 %v704_v17  ;;  %v705_v21 = vmul.f32 %v697_v20, %v697_v20 }
 0x2ce   : > { %v1689_v22 = vsub.f32 %v1647_v31, %v678_v19  ;;  %v698_v23 = vsel %vm689_vm0, %v1684_v18, 0.0 }
 0x2cf   : > { %v706_v24 = vmul.f32 %v698_v23, %v698_v23 }
 0x2d0   : > { %718 = vadd.xlane.f32.xlu0 %v705_v21  ;;  %v699_v25 = vsel %vm689_vm0, %v1689_v22, 0.0 }
 0x2d1   : > { %720 = vadd.xlane.f32.xlu1 %v706_v24  ;;  %v856_v26 = vpop.xlane.xlu0 %855  ;;  %v707_v27 = vmul.f32 %v699_v25, %v699_v25 }
 0x2d2   : > { %v857_v28 = vrot.slane %v856_v26, 4 }
 0x2d4   : > { %v858_v29 = vadd.f32 %v857_v28, %v856_v26  ;;  %722 = vadd.xlane.f32.xlu0 %v707_v27 }
 0x2d6   : > { %v859_v30 = vrot.slane %v858_v29, 2 }
 0x2d8   : > { %v860_v31 = vadd.f32 %v859_v30, %v858_v29 }
 0x2da   : > { %v861_v32 = vrot.slane %v860_v31, 1 }
 0x2dc   : > { %v862_v33 = vadd.f32 %v861_v32, %v860_v31 }
 0x2de   : > { %1127 = vpush %v862_v33 }
 0x30f   : > { %s1128_s30 = spop %1127 }
 0x310   : > { %v864_v34 = vstv %s1128_s30 }
 0x311   : > { %865 = vst [vmem:[%s295_s20] sm:$0xff] %v864_v34 }
 0x312   : > { %1316 = shalt.err (!%p1313_p7)
}
 0x313   : > { %s1317_s11 = scalar_lea.hbm %s1702_s8, 128  ;;  %s1321_s30 = scalar_lea.hbm %s1843_s6, 256 }
 0x314   : > { %p1318_p9 = scmp.ne.s32.totalorder %s1702_s8, %s1317_s11  ;;  %p1322_p5 = scmp.lt.u32.totalorder %s1702_s8, %s1843_s6 }
 0x315   : > { %p1323_p11 = scmp.lt.u32.totalorder %s1321_s30, %s1317_s11  ;;  %p1325_p4 = scmp.lt.u32.totalorder %s1317_s11, %s1702_s8 }
 0x316   : > { %p1319_p2 = pnand %p1318_p9, %p1543_p12 }
 0x317   : > { %p1324_p1 = por %p1323_p11, %p1322_p5 }
 0x318   : > { %p1320_p0 = pneg %p1319_p2 }
 0x319   : > { %p1326_p6 = por %p1325_p4, %p1324_p1 }
 0x31b   : > { %p1327_p8 = pnand %p1326_p6, %p1320_p0 }
 0x31d   : > { %1330 = shalt.err (!%p1327_p8)
}
 0x31e   : > { %1136 = dma.vmem_to_hbm [thread:$0]  (%p1543_p12), %s1697_s18, 128, %s1702_s8, %s872_s15   ;;  %v1737_v60 = vld [vmem:[%s1840_s3] ss:$0 sm:$0xff] }
 0x31f   : > { %v812_v8 = vmul.f32 %v1737_v60, %v1658_v56  ;;  %s1766_s29 = scalar_lea.vmem [#allocation7], %s1021_s17  ;;  %s1054_s17 = sshll.u32 %s1473_s25, 10 }
 0x320   : > { %s885_s19 = sshll.u32 %s1766_s29, 4  ;;  %s1790_s20 = scalar_lea.hbm %s1842_s5, %s1054_s17  ;;  %s1792_s19 = int_to_ptr.vmem [resolvable:$true] %s885_s19 }
 0x321   : > { %s867_s7 = scalar_lea.sflag [#allocation4], %s1591_s16  ;;  %s1331_s25 = scalar_lea.vmem %s1792_s19, 1024 }
 0x322   : > { %p1332_p10 = scmp.ne.s32.totalorder %s1792_s19, %s1331_s25  ;;  %s1414_s30 = smov [#allocation7]  }
 0x323   : > { %s1335_s26 = sshll.u32 %s1414_s30, 4  ;;  %s1336_s26 = int_to_ptr.vmem [resolvable:$false] %s1335_s26 }
 0x324   : > { %p1333_p13 = pnand %p1332_p10, %p1543_p12  ;;  %s1337_s12 = scalar_lea.vmem %s1336_s26, 2048 }
 0x325   : > { %p1338_p7 = scmp.lt.s32.totalorder %s1792_s19, %s1336_s26  ;;  %p1339_p9 = scmp.lt.s32.totalorder %s1337_s12, %s1331_s25 }
 0x326   : > { %p1334_p3 = pneg %p1333_p13 }
 0x327   : > { %p1340_p2 = por %p1339_p9, %p1338_p7 }
 0x329   : > { %p1341_p0 = pnand %p1340_p2, %p1334_p3 }
 0x351   : > { %v713_v35 = vpop.xlane.xlu1 %712 }
 0x352   : > { %v726_v36 = vmul.f32 0.032258064, %v713_v35 }
 0x354   : > { %1213 = vrsqrt.f32 %v726_v36  ;;  %vm748_vm1 = vcmp.eq.f32.partialorder %v726_v36, inf  ;;  %v751_v51 = vand.u32 2147483648, %v726_v36  ;;  %vm750_vm2 = vcmp.eq.f32.partialorder %v726_v36, 0.0 }
 0x355   : > { %v709_v37 = vpop.xlane.xlu1 %708  ;;  %v715_v38 = vpop.xlane.xlu0 %714 }
 0x356   : > { %v724_v39 = vmul.f32 0.032258064, %v709_v37  ;;  %v727_v40 = vmul.f32 0.032258064, %v715_v38  ;;  %v1045_v37 = vld [vmem:[%s1841_s4] ss:$0 sm:$0xff] }
 0x358   : > { %1215 = vrsqrt.f32 %v724_v39  ;;  %vm734_vm3 = vcmp.eq.f32.partialorder %v724_v39, inf  ;;  %vm736_vm4 = vcmp.eq.f32.partialorder %v724_v39, 0.0  ;;  %v737_v1 = vand.u32 2147483648, %v724_v39 }
 0x359   : > { %1217 = vrsqrt.f32 %v727_v40  ;;  %v711_v41 = vpop.xlane.xlu0 %710  ;;  %vm755_vm5 = vcmp.eq.f32.partialorder %v727_v40, inf  ;;  %v758_v5 = vand.u32 2147483648, %v727_v40  ;;  %vm757_vm6 = vcmp.eq.f32.partialorder %v727_v40, 0.0 }
 0x35a   : > { %v725_v42 = vmul.f32 0.032258064, %v711_v41  ;;  %v717_v43 = vpop.xlane.xlu1 %716 }
 0x35b   : > { %v728_v44 = vmul.f32 0.032258064, %v717_v43 }
 0x35c   : > { %1219 = vrsqrt.f32 %v725_v42  ;;  %vm741_vm7 = vcmp.eq.f32.partialorder %v725_v42, inf  ;;  %vm743_vm8 = vcmp.eq.f32.partialorder %v725_v42, 0.0  ;;  %v744_v16 = vand.u32 2147483648, %v725_v42 }
 0x35d   : > { %1221 = vrsqrt.f32 %v728_v44  ;;  %v719_v45 = vpop.xlane.xlu0 %718  ;;  %vm762_vm9 = vcmp.eq.f32.partialorder %v728_v44, inf  ;;  %v765_v20 = vand.u32 2147483648, %v728_v44  ;;  %vm764_vm10 = vcmp.eq.f32.partialorder %v728_v44, 0.0 }
 0x35e   : > { %v1214_v46 = vpop.eup %1213  ;;  %v1726_v47 = vmul.f32 0.032258064, %v719_v45  ;;  %v721_v48 = vpop.xlane.xlu1 %720  ;;  %v810_v45 = vmul.f32 %v1737_v60, %v1661_v57  ;;  %v811_v57 = vmul.f32 %v1737_v60, %v1671_v63 }
 0x35f   : > { %v747_v49 = vmul.f32 %v1214_v46, %v726_v36  ;;  %v1728_v50 = vmul.f32 0.032258064, %v721_v48 }
 0x360   : > { %1223 = vrsqrt.f32 %v1726_v47  ;;  %vm769_vm11 = vcmp.eq.f32.partialorder %v1726_v47, inf  ;;  %vm771_vm12 = vcmp.eq.f32.partialorder %v1726_v47, 0.0  ;;  %v772_v29 = vand.u32 2147483648, %v1726_v47 }
 0x361   : > { %v749_v53 = vsel %vm748_vm1, %v726_v36, %v747_v49  ;;  %1225 = vrsqrt.f32 %v1728_v50  ;;  %v723_v54 = vpop.xlane.xlu0 %722  ;;  %vm776_vm13 = vcmp.eq.f32.partialorder %v1728_v50, inf  ;;  %v779_v32 = vand.u32 2147483648, %v1728_v50 }
 0x362   : > { %v1216_v55 = vpop.eup %1215  ;;  %v752_v52 = vsel %vm750_vm2, %v751_v51, %v749_v53  ;;  %v1732_v58 = vmul.f32 0.032258064, %v723_v54  ;;  %vm778_vm14 = vcmp.eq.f32.partialorder %v1728_v50, 0.0  ;;  %v813_v49 = vmul.f32 %v1737_v60, %v1666_v0 }
 0x363   : > { %v1218_v59 = vpop.eup %1217  ;;  %v790_v61 = vadd.f32 1e-06, %v752_v52  ;;  %v733_v62 = vmul.f32 %v1216_v55, %v724_v39  ;;  %v814_v0 = vmul.f32 %v1737_v60, %v1677_v4 }
 0x364   : > { %v754_v2 = vmul.f32 %v1218_v59, %v727_v40  ;;  %1227 = vrsqrt.f32 %v1732_v58  ;;  %vm783_vm15 = vcmp.eq.f32.partialorder %v1732_v58, inf  ;;  %v786_v43 = vand.u32 2147483648, %v1732_v58 }
 0x365   : > { %1229 = vrcp.f32 %v790_v61  ;;  %v735_v3 = vsel %vm734_vm3, %v724_v39, %v733_v62  ;;  %vm785_vm0 = vcmp.eq.f32.partialorder %v1732_v58, 0.0 }
 0x366   : > { %v1220_v7 = vpop.eup %1219  ;;  %v738_v9 = vsel %vm736_vm4, %v737_v1, %v735_v3  ;;  %v756_v10 = vsel %vm755_vm5, %v727_v40, %v754_v2  ;;  %v815_v1 = vmul.f32 %v1737_v60, %v1679_v6  ;;  %v816_v3 = vmul.f32 %v1737_v60, %v1684_v18 }
 0x367   : > { %v1222_v11 = vpop.eup %1221  ;;  %v788_v12 = vadd.f32 1e-06, %v738_v9  ;;  %v759_v13 = vsel %vm757_vm6, %v758_v5, %v756_v10  ;;  %v740_v14 = vmul.f32 %v1220_v7, %v725_v42  ;;  %v817_v9 = vmul.f32 %v1737_v60, %v1689_v22 }
 0x368   : > { %v791_v15 = vadd.f32 1e-06, %v759_v13  ;;  %v761_v17 = vmul.f32 %v1222_v11, %v728_v44 }
 0x369   : > { %1231 = vrcp.f32 %v788_v12  ;;  %v742_v19 = vsel %vm741_vm7, %v725_v42, %v740_v14 }
 0x36a   : > { %v1224_v21 = vpop.eup %1223  ;;  %1233 = vrcp.f32 %v791_v15  ;;  %v745_v23 = vsel %vm743_vm8, %v744_v16, %v742_v19  ;;  %v763_v56 = vsel %vm762_vm9, %v728_v44, %v761_v17 }
 0x36b   : > { %v1226_v24 = vpop.eup %1225  ;;  %v789_v25 = vadd.f32 1e-06, %v745_v23  ;;  %v766_v26 = vsel %vm764_vm10, %v765_v20, %v763_v56  ;;  %v768_v27 = vmul.f32 %v1224_v21, %v1726_v47 }
 0x36c   : > { %v792_v28 = vadd.f32 1e-06, %v766_v26  ;;  %v775_v30 = vmul.f32 %v1226_v24, %v1728_v50 }
 0x36d   : > { %1235 = vrcp.f32 %v789_v25  ;;  %v770_v31 = vsel %vm769_vm11, %v1726_v47, %v768_v27 }
 0x36e   : > { %v1228_v33 = vpop.eup %1227  ;;  %1237 = vrcp.f32 %v792_v28  ;;  %v773_v34 = vsel %vm771_vm12, %v772_v29, %v770_v31  ;;  %v777_v35 = vsel %vm776_vm13, %v1728_v50, %v775_v30 }
 0x36f   : > { %v1230_v36 = vpop.eup %1229  ;;  %v793_v38 = vadd.f32 1e-06, %v773_v34  ;;  %v780_v39 = vsel %vm778_vm14, %v779_v32, %v777_v35  ;;  %v782_v40 = vmul.f32 %v1228_v33, %v1732_v58 }
 0x370   : > { %v820_v41 = vmul.f32 %v1230_v36, %v812_v8  ;;  %v794_v42 = vadd.f32 1e-06, %v780_v39 }
 0x371   : > { %1239 = vrcp.f32 %v793_v38  ;;  %v784_v44 = vsel %vm783_vm15, %v1732_v58, %v782_v40 }
 0x372   : > { %v834_v46 = vadd.f32 %v1045_v37, %v820_v41  ;;  %1241 = vrcp.f32 %v794_v42  ;;  %v787_v47 = vsel %vm785_vm0, %v786_v43, %v784_v44 }
 0x373   : > { %v1232_v48 = vpop.eup %1231  ;;  %v795_v50 = vadd.f32 1e-06, %v787_v47 }
 0x374   : > { %v1234_v51 = vpop.eup %1233  ;;  %842 = vst [vmem:[%s1766_s29 + $0x10] sm:$0xff] %v834_v46  ;;  %v818_v53 = vmul.f32 %v1232_v48, %v810_v45 }
 0x375   : > { %v821_v54 = vmul.f32 %v1234_v51, %v813_v49  ;;  %1243 = vrcp.f32 %v795_v50 }
 0x376   : > { %v832_v55 = vadd.f32 %v1045_v37, %v818_v53 }
 0x377   : > { %v1236_v52 = vpop.eup %1235  ;;  %v835_v58 = vadd.f32 %v1045_v37, %v821_v54 }
 0x378   : > { %v1238_v59 = vpop.eup %1237  ;;  %840 = vst [vmem:[%s1766_s29] sm:$0xff] %v832_v55  ;;  %v819_v61 = vmul.f32 %v1236_v52, %v811_v57 }
 0x379   : > { %843 = vst [vmem:[%s1766_s29 + $0x18] sm:$0xff] %v835_v58  ;;  %v822_v62 = vmul.f32 %v1238_v59, %v814_v0 }
 0x37a   : > { %v833_v63 = vadd.f32 %v1045_v37, %v819_v61 }
 0x37b   : > { %v1240_v2 = vpop.eup %1239  ;;  %v836_v5 = vadd.f32 %v1045_v37, %v822_v62 }
 0x37c   : > { %v1242_v4 = vpop.eup %1241  ;;  %841 = vst [vmem:[%s1766_s29 + $0x8] sm:$0xff] %v833_v63  ;;  %v823_v7 = vmul.f32 %v1240_v2, %v815_v1 }
 0x37d   : > { %844 = vst [vmem:[%s1766_s29 + $0x20] sm:$0xff] %v836_v5  ;;  %v824_v8 = vmul.f32 %v1242_v4, %v816_v3 }
 0x37e   : > { %v837_v6 = vadd.f32 %v1045_v37, %v823_v7 }
 0x37f   : > { %v1244_v10 = vpop.eup %1243  ;;  %v838_v11 = vadd.f32 %v1045_v37, %v824_v8 }
 0x380   : > { %845 = vst [vmem:[%s1766_s29 + $0x28] sm:$0xff] %v837_v6  ;;  %v825_v12 = vmul.f32 %v1244_v10, %v817_v9 }
 0x381   : > { %846 = vst [vmem:[%s1766_s29 + $0x30] sm:$0xff] %v838_v11 }
 0x382   : > { %v839_v18 = vadd.f32 %v1045_v37, %v825_v12 }
 0x384   : > { %847 = vst [vmem:[%s1766_s29 + $0x38] sm:$0xff] %v839_v18 }
 0x385   : > { %1344 = shalt.err (!%p1341_p0)
}
 0x386   : > { %s1345_s18 = scalar_lea.hbm %s1790_s20, 1024  ;;  %s1349_s27 = scalar_lea.hbm %s1842_s5, 2048 }
 0x387   : > { %p1346_p5 = scmp.ne.s32.totalorder %s1790_s20, %s1345_s18  ;;  %p1350_p4 = scmp.lt.u32.totalorder %s1790_s20, %s1842_s5 }
 0x388   : > { %p1351_p6 = scmp.lt.u32.totalorder %s1349_s27, %s1345_s18  ;;  %p1353_p10 = scmp.lt.u32.totalorder %s1345_s18, %s1790_s20 }
 0x389   : > { %p1347_p11 = pnand %p1346_p5, %p1543_p12 }
 0x38a   : > { %p1352_p8 = por %p1351_p6, %p1350_p4 }
 0x38b   : > { %p1348_p1 = pneg %p1347_p11 }
 0x38c   : > { %p1354_p13 = por %p1353_p10, %p1352_p8 }
 0x38e   : > { %p1355_p3 = pnand %p1354_p13, %p1348_p1 }
 0x390   : > { %1358 = shalt.err (!%p1355_p3)
}
 0x391   : > { %s1415_s10 = smov 128   ;;  %s1416_s11 = smov 8  }
 0x392   : > { %1135 = dma.vmem_to_hbm [thread:$0]  (%p1543_p12), %s1792_s19, 1024, %s1790_s20, %s867_s7, %s1415_s10, %s1415_s10, %s1416_s11  }
 0x393 PF: > { %s913_s25 = sand.u32 1, %s1393_s21   ;;  %p1858_p7 = scmp.ne.s32.totalorder %s1848_s28, 0 }
 0x394   : > { %p1859_p9 = scmp.ge.s32.totalorder %s1405_s24, 2  ;;  %s914_s30 = scalar_lea.sflag [#allocation4], %s913_s25 }
 0x396   : > { %p1148_p2 = pnand %p1859_p9, %p1858_p7 }
 0x398   : > { %1384 = dma.done.wait (!%p1148_p2), %s914_s30, 1024  }
 0x399   : > { %1386 = vsyncadd (!%p1148_p2), %s914_s30, 4294966272  ;;  %s923_s26 = scalar_lea.sflag [#allocation9], %s913_s25 }
 0x39a   : > { %1388 = dma.done.wait (!%p1148_p2), %s923_s26, 128  }
 0x39b   : > { %1390 = vsyncadd (!%p1148_p2), %s923_s26, 4294967168  ;;  %p24_p12 = scmp.ge.s32.totalorder %s1508_s9, 4   ;;  %s1860_s21 = smov %s1397_s22 }
 0x39c   : > { %s1861_s22 = smov %s1401_s23  ;;  %s1862_s23 = smov %s1539_s13 }
 0x39d   : > { %s1863_s24 = smov %s1508_s9  ;;  %26 = sbr.rel (!%p24_p12) target bundleno = 8 (0x8), region = 108 }
 0x3a4   :  { %928 = vsyncpa [#allocation3], 1 }
 0x3a5   :  { %930 = vsyncpa [#allocation3 + $0x1], 1 }
 0x3a6   :  { %931 = vsyncpa [#allocation6], 1 }
 0x3a7   :  { %932 = vsyncpa [#allocation4], 1 }
 0x3a8   :  { %934 = vsyncpa [#allocation4 + $0x1], 1 }
 0x3a9   :  { %935 = vsyncpa [#allocation9], 1 }
 0x3aa   :  { %937 = vsyncpa [#allocation9 + $0x1], 1 }

</bundles_post_ra>
